<compile_context>
chip_gen: v6e
topology: v6e:2x2x1
jax: 0.10.0
libtpu: 0.0.40
codegen_flags: <defaults>
</compile_context>

<pallas_src>
import functools

import jax
import jax.numpy as jnp
from jax import lax
from jax.experimental import pallas as pl
from jax.experimental.pallas import tpu as pltpu

SMOOTH = 1e-5


def _vmem_capacity_bytes() -> int:
    try:
        return int(pltpu.get_tpu_info().vmem_capacity_bytes)
    except Exception:
        return 64 << 20  # conservative default (v7x per-TC VMEM)


def _bf16_math_ok() -> bool:
    """bf16 VPU/EUP math exists on v6e/v7x, not v5e; default to f32 math."""
    try:
        ver = str(getattr(pltpu.get_tpu_info(), "chip_version", "")).lower()
    except Exception:
        return False
    return any(tag in ver for tag in ("v6", "6e", "v7", "7x"))


def _chunk_update(x_ref, t_ref, pa, pb, sl, valid_cols, compute_dtype):
    """Accumulate one 128-lane column chunk into the lane-partial sums.

    sigmoid(x) = 0.5*(1 + s) with s = tanh(0.5*x), so
        2*sum(p*t)      = sum(t*s + t)               -> A
        sum(p)+sum(t)   = 0.5*M + sum(0.5*s + t)     -> B (+0.5*M at finalize)
    i.e. ~5 VPU ops + 1 EUP op per element and only two accumulators.
    """
    x = x_ref[:, sl].astype(compute_dtype)
    t = t_ref[:, sl].astype(compute_dtype)
    s = jnp.tanh(0.5 * x)                      # single EUP transcendental/elem
    va = t * s + t                             # summand of 2*sum(p*t)
    vb = 0.5 * s + t                           # summand of sum(p)+sum(t)-0.5*M
    if valid_cols is not None:                 # only the ragged boundary chunk
        col = lax.broadcasted_iota(jnp.int32, va.shape, 1)
        keep = col < valid_cols
        va = jnp.where(keep, va, 0.0)
        vb = jnp.where(keep, vb, 0.0)
    return pa + va.astype(jnp.float32), pb + vb.astype(jnp.float32)


def _regdice_kernel(x_ref, t_ref, dice_ref, acc_a, acc_b, *, m_valid,
                    compute_dtype):
    # x_ref, t_ref : (tile_n, tile_m) tiles of the (B*C, prod(spatial)) slab.
    # dice_ref     : (tile_n, 1) per-row dice, written on the last spatial tile.
    # acc_a, acc_b : (tile_n, acc_w) f32 lane-partial accumulators, resident
    #                across the "arbitrary" spatial grid axis.
    k = pl.program_id(1)
    nk = pl.num_programs(1)
    tile_n, tile_m = x_ref.shape
    lane_chunks = tile_m // 128 if tile_m % 128 == 0 else 0
    tail = m_valid % tile_m                    # static; 0 -> all tiles valid

    @pl.when(k == 0)
    def _init():
        acc_a[...] = jnp.zeros_like(acc_a)
        acc_b[...] = jnp.zeros_like(acc_b)

    def _sweep(valid_cols):
        pa = acc_a[...]
        pb = acc_b[...]
        if lane_chunks:
            # Lane-partial accumulation: plain VPU adds per 128-lane chunk; the
            # single cross-lane (XLU) reduce happens only in the finalize.
            for c in range(lane_chunks):
                lo = c * 128
                if valid_cols is not None and lo >= valid_cols:
                    continue                   # chunk fully past the tail
                cv = None
                if valid_cols is not None and lo + 128 > valid_cols:
                    cv = valid_cols - lo       # static partial-chunk mask
                pa, pb = _chunk_update(x_ref, t_ref, pa, pb,
                                       slice(lo, lo + 128), cv, compute_dtype)
        else:
            # tile_m == full spatial extent (< 128 lanes): one tiny pass.
            x = x_ref[...].astype(jnp.float32)
            t = t_ref[...].astype(jnp.float32)
            s = jnp.tanh(0.5 * x)
            pa = pa + jnp.sum(t * s + t, axis=-1, keepdims=True)
            pb = pb + jnp.sum(0.5 * s + t, axis=-1, keepdims=True)
        acc_a[...] = pa
        acc_b[...] = pb

    if tail == 0:
        _sweep(None)                           # aligned: no mask code emitted
    else:
        @pl.when(k < nk - 1)
        def _full_tiles():
            _sweep(None)                       # steady state: no mask work

        @pl.when(k == nk - 1)
        def _tail_tile():
            _sweep(tail)                       # mask only the boundary chunk

    @pl.when(k == nk - 1)
    def _finalize():
        a = jnp.sum(acc_a[...], axis=-1, keepdims=True)
        b = jnp.sum(acc_b[...], axis=-1, keepdims=True)
        dice = (a + SMOOTH) / (b + 0.5 * m_valid + SMOOTH)
        dice_ref[...] = dice.astype(dice_ref.dtype)


def _pick_tiles(n, m, itemsize, vmem_capacity):
    """Pick (tile_n, tile_m).

    tile_n: multiple of 8 (or the full extent when n < 8), capped at 32 so the
            "parallel" row axis has >= 2 blocks once n >= 64 (megacore / v7x
            dual-TC) and per-chunk vreg pressure stays low.
    tile_m: multiple of 128 (or the full extent when m < 128), targeting
            ~2 MiB per input block, >= ~4 spatial steps for large rows, and
            <= ~35% of this generation's VMEM for the 2-input x 2-buffer set.
    """
    if n < 8:
        tile_n = n
    else:
        tile_n = max(8, min(32, ((n // 2) // 8) * 8))

    if m < 128:
        return tile_n, m

    lane_cap = (m // 128) * 128                                   # <= array
    sweet = max(128, ((2 << 20) // (tile_n * itemsize)) // 128 * 128)
    budget = max(128,
                 (int(vmem_capacity * 0.35) // (4 * tile_n * itemsize))
                 // 128 * 128)
    steps = max(8 * 128, ((m // 4) // 128) * 128)                 # >= ~4 steps
    tile_m = min(lane_cap, sweet, budget, steps)
    return tile_n, max(128, tile_m)


def nonlin_regdice_loss(net_output: jax.Array, target: jax.Array) -> jax.Array:
    """net_output, target: (B, C, *spatial) float arrays -> scalar f32 loss.

    No wrapper-side padding: inputs stream straight from HBM.  Pass bf16
    activations to halve HBM traffic; accumulation is f32 in-kernel.
    """
    assert net_output.shape == target.shape
    assert net_output.ndim >= 3
    B, C = net_output.shape[:2]
    n = B * C
    x2d = net_output.reshape(n, -1)
    t2d = target.reshape(n, -1)
    m = x2d.shape[1]

    # bf16 elementwise math only where the VPU/EUP supports it (v6e/v7x);
    # otherwise f32.  f32 inputs always compute in f32.
    if (x2d.dtype == jnp.bfloat16 and t2d.dtype == jnp.bfloat16
            and _bf16_math_ok()):
        compute_dtype = jnp.bfloat16
    else:
        compute_dtype = jnp.float32

    itemsize = max(x2d.dtype.itemsize, t2d.dtype.itemsize)
    vmem_capacity = _vmem_capacity_bytes()
    tile_n, tile_m = _pick_tiles(n, m, itemsize, vmem_capacity)
    acc_w = 128 if tile_m % 128 == 0 else 1

    grid = (pl.cdiv(n, tile_n), pl.cdiv(m, tile_m))

    needed = (
        4 * tile_n * tile_m * itemsize      # 2 inputs x 2 pipeline buffers
        + 2 * tile_n * 128 * 4              # f32 accumulators (lane padded)
        + (4 << 20)                         # headroom (output buffers, spills)
    )
    vmem_limit = int(min(max(needed, 16 << 20), int(vmem_capacity * 0.6)))

    kernel = functools.partial(_regdice_kernel, m_valid=m,
                               compute_dtype=compute_dtype)

    dice = pl.pallas_call(
        kernel,
        out_shape=jax.ShapeDtypeStruct((n, 1), jnp.float32),
        grid_spec=pltpu.PrefetchScalarGridSpec(
            num_scalar_prefetch=0,
            grid=grid,
            # TODO(synk): if profiling shows exposed DMA, sweep
            # pipeline_mode=pl.Buffered(3) on these two input BlockSpecs.
            in_specs=[
                pl.BlockSpec((tile_n, tile_m), lambda i, k: (i, k)),
                pl.BlockSpec((tile_n, tile_m), lambda i, k: (i, k)),
            ],
            out_specs=pl.BlockSpec((tile_n, 1), lambda i, k: (i, 0)),
            scratch_shapes=[
                pltpu.VMEM((tile_n, acc_w), jnp.float32),  # A = 2*sum(p*t)
                pltpu.VMEM((tile_n, acc_w), jnp.float32),  # B = sum(p)+sum(t)-M/2
            ],
        ),
        compiler_params=pltpu.CompilerParams(
            dimension_semantics=("parallel", "arbitrary"),
            vmem_limit_bytes=vmem_limit,
        ),
        cost_estimate=pl.CostEstimate(
            flops=7 * n * m,
            transcendentals=n * m,
            bytes_accessed=n * m * (x2d.dtype.itemsize + t2d.dtype.itemsize)
            + 4 * n,
        ),
    )(x2d, t2d)

    # Tiny final reduction in plain JAX (output is exactly (B*C, 1): ragged-row
    # boundary blocks are dropped on store, so no slicing is needed).
    return (1.0 - jnp.mean(dice)).astype(jnp.float32)


def _reference(net_output, target):
    p = jax.nn.sigmoid(net_output.astype(jnp.float32))
    t = target.astype(jnp.float32)
    axes = tuple(range(2, net_output.ndim))
    inter = jnp.sum(p * t, axis=axes)
    dice = (2.0 * inter + SMOOTH) / (
        jnp.sum(p, axis=axes) + jnp.sum(t, axis=axes) + SMOOTH
    )
    return 1.0 - jnp.mean(dice)


if __name__ == "__main__":
    key = jax.random.PRNGKey(0)
    k1, k2, k3, k4 = jax.random.split(key, 4)

    # Case 1: aligned shapes (B, C, H, W) = (2, 4, 16, 16) -> no mask code.
    net_output = jax.random.normal(k1, (2, 4, 16, 16), dtype=jnp.float32)
    target = jax.random.uniform(k2, (2, 4, 16, 16), dtype=jnp.float32)
    loss = nonlin_regdice_loss(net_output, target)
    jax.block_until_ready(loss)
    ref = _reference(net_output, target)
    assert jnp.allclose(loss, ref, atol=1e-5, rtol=1e-5), (loss, ref)

    # Case 2: ragged rows + ragged spatial tail, exercised WITHOUT any
    # wrapper-side padding (boundary blocks masked / dropped in-kernel).
    net_output2 = jax.random.normal(k3, (2, 3, 15, 17), dtype=jnp.float32)
    target2 = jax.random.uniform(k4, (2, 3, 15, 17), dtype=jnp.float32)
    loss2 = nonlin_regdice_loss(net_output2, target2)
    jax.block_until_ready(loss2)
    ref2 = _reference(net_output2, target2)
    assert jnp.allclose(loss2, ref2, atol=1e-5, rtol=1e-5), (loss2, ref2)

    print("KERNEL_OK")
</pallas_src>

<mosaic_0001>
module attributes {stable_mosaic.version = 11 : i64} {
  func.func @_regdice_kernel(%arg0: i32, %arg1: i32, %arg2: memref<8x256xf32, #tpu.memory_space<vmem>>, %arg3: memref<8x256xf32, #tpu.memory_space<vmem>>, %arg4: memref<8x1xf32, #tpu.memory_space<vmem>>, %arg5: memref<8x128xf32, #tpu.memory_space<vmem>>, %arg6: memref<8x128xf32, #tpu.memory_space<vmem>>) attributes {dimension_semantics = [#tpu.dimension_semantics<parallel>, #tpu.dimension_semantics<arbitrary>], iteration_bounds = array<i64: 1, 1>, scalar_prefetch = 0 : i64, scratch_operands = 2 : i64, tpu.core_type = #tpu.core_type<tc>, window_params = [{transform_indices = @transform_0, window_bounds = array<i64: 8, 256>}, {transform_indices = @transform_1, window_bounds = array<i64: 8, 256>}, {transform_indices = @transform_2, window_bounds = array<i64: 8, 1>}]} {
    %c0_i32 = arith.constant 0 : i32
    %0 = arith.cmpi eq, %arg1, %c0_i32 : i32
    %1 = arith.extui %0 : i1 to i32
    %c0_i32_0 = arith.constant 0 : i32
    %2 = arith.cmpi ne, %1, %c0_i32_0 : i32
    scf.if %2 {
      %cst_20 = arith.constant 0.000000e+00 : f32
      %34 = vector.broadcast %cst_20 : f32 to vector<8x128xf32>
      %c0_21 = arith.constant 0 : index
      %c0_22 = arith.constant 0 : index
      %35 = vector.load %arg5[%c0_21, %c0_22] : memref<8x128xf32, #tpu.memory_space<vmem>>, vector<8x128xf32>
      tpu.vector_store %arg5[%c0_21, %c0_22], %34 {strides = array<i32>} : memref<8x128xf32, #tpu.memory_space<vmem>>, vector<8x128xf32>,
      %cst_23 = arith.constant 0.000000e+00 : f32
      %36 = vector.broadcast %cst_23 : f32 to vector<8x128xf32>
      %c0_24 = arith.constant 0 : index
      %c0_25 = arith.constant 0 : index
      %37 = vector.load %arg6[%c0_24, %c0_25] : memref<8x128xf32, #tpu.memory_space<vmem>>, vector<8x128xf32>
      tpu.vector_store %arg6[%c0_24, %c0_25], %36 {strides = array<i32>} : memref<8x128xf32, #tpu.memory_space<vmem>>, vector<8x128xf32>,
    } else {
    }
    %c0 = arith.constant 0 : index
    %c0_1 = arith.constant 0 : index
    %3 = vector.load %arg5[%c0, %c0_1] : memref<8x128xf32, #tpu.memory_space<vmem>>, vector<8x128xf32>
    %c0_2 = arith.constant 0 : index
    %c0_3 = arith.constant 0 : index
    %4 = vector.load %arg6[%c0_2, %c0_3] : memref<8x128xf32, #tpu.memory_space<vmem>>, vector<8x128xf32>
    %c0_4 = arith.constant 0 : index
    %c0_5 = arith.constant 0 : index
    %5 = vector.load %arg2[%c0_4, %c0_5] : memref<8x256xf32, #tpu.memory_space<vmem>>, vector<8x128xf32>
    %c0_6 = arith.constant 0 : index
    %c0_7 = arith.constant 0 : index
    %6 = vector.load %arg3[%c0_6, %c0_7] : memref<8x256xf32, #tpu.memory_space<vmem>>, vector<8x128xf32>
    %cst = arith.constant 5.000000e-01 : f32
    %7 = vector.broadcast %cst : f32 to vector<8x128xf32>
    %8 = arith.mulf %7, %5 : vector<8x128xf32>
    %9 = math.tanh %8 : vector<8x128xf32>
    %10 = arith.mulf %6, %9 : vector<8x128xf32>
    %11 = arith.addf %10, %6 : vector<8x128xf32>
    %cst_8 = arith.constant 5.000000e-01 : f32
    %12 = vector.broadcast %cst_8 : f32 to vector<8x128xf32>
    %13 = arith.mulf %12, %9 : vector<8x128xf32>
    %14 = arith.addf %13, %6 : vector<8x128xf32>
    %15 = arith.addf %3, %11 : vector<8x128xf32>
    %16 = arith.addf %4, %14 : vector<8x128xf32>
    %c0_9 = arith.constant 0 : index
    %c128 = arith.constant 128 : index
    %17 = vector.load %arg2[%c0_9, %c128] : memref<8x256xf32, #tpu.memory_space<vmem>>, vector<8x128xf32>
    %c0_10 = arith.constant 0 : index
    %c128_11 = arith.constant 128 : index
    %18 = vector.load %arg3[%c0_10, %c128_11] : memref<8x256xf32, #tpu.memory_space<vmem>>, vector<8x128xf32>
    %cst_12 = arith.constant 5.000000e-01 : f32
    %19 = vector.broadcast %cst_12 : f32 to vector<8x128xf32>
    %20 = arith.mulf %19, %17 : vector<8x128xf32>
    %21 = math.tanh %20 : vector<8x128xf32>
    %22 = arith.mulf %18, %21 : vector<8x128xf32>
    %23 = arith.addf %22, %18 : vector<8x128xf32>
    %cst_13 = arith.constant 5.000000e-01 : f32
    %24 = vector.broadcast %cst_13 : f32 to vector<8x128xf32>
    %25 = arith.mulf %24, %21 : vector<8x128xf32>
    %26 = arith.addf %25, %18 : vector<8x128xf32>
    %27 = arith.addf %15, %23 : vector<8x128xf32>
    %28 = arith.addf %16, %26 : vector<8x128xf32>
    %c0_14 = arith.constant 0 : index
    %c0_15 = arith.constant 0 : index
    %29 = vector.load %arg5[%c0_14, %c0_15] : memref<8x128xf32, #tpu.memory_space<vmem>>, vector<8x128xf32>
    tpu.vector_store %arg5[%c0_14, %c0_15], %27 {strides = array<i32>} : memref<8x128xf32, #tpu.memory_space<vmem>>, vector<8x128xf32>,
    %c0_16 = arith.constant 0 : index
    %c0_17 = arith.constant 0 : index
    %30 = vector.load %arg6[%c0_16, %c0_17] : memref<8x128xf32, #tpu.memory_space<vmem>>, vector<8x128xf32>
    tpu.vector_store %arg6[%c0_16, %c0_17], %28 {strides = array<i32>} : memref<8x128xf32, #tpu.memory_space<vmem>>, vector<8x128xf32>,
    %c0_i32_18 = arith.constant 0 : i32
    %31 = arith.cmpi eq, %arg1, %c0_i32_18 : i32
    %32 = arith.extui %31 : i1 to i32
    %c0_i32_19 = arith.constant 0 : i32
    %33 = arith.cmpi ne, %32, %c0_i32_19 : i32
    scf.if %33 {
      %c0_20 = arith.constant 0 : index
      %c0_21 = arith.constant 0 : index
      %34 = vector.load %arg5[%c0_20, %c0_21] : memref<8x128xf32, #tpu.memory_space<vmem>>, vector<8x128xf32>
      %cst_22 = arith.constant dense<0.000000e+00> : vector<8xf32>
      %35 = vector.multi_reduction <add>, %34, %cst_22 [1] : vector<8x128xf32> to vector<8xf32>
      %36 = vector.shape_cast %35 : vector<8xf32> to vector<8x1xf32>
      %c0_23 = arith.constant 0 : index
      %c0_24 = arith.constant 0 : index
      %37 = vector.load %arg6[%c0_23, %c0_24] : memref<8x128xf32, #tpu.memory_space<vmem>>, vector<8x128xf32>
      %cst_25 = arith.constant dense<0.000000e+00> : vector<8xf32>
      %38 = vector.multi_reduction <add>, %37, %cst_25 [1] : vector<8x128xf32> to vector<8xf32>
      %39 = vector.shape_cast %38 : vector<8xf32> to vector<8x1xf32>
      %cst_26 = arith.constant 9.99999974E-6 : f32
      %40 = vector.broadcast %cst_26 : f32 to vector<8x1xf32>
      %41 = arith.addf %36, %40 : vector<8x1xf32>
      %cst_27 = arith.constant 1.280000e+02 : f32
      %42 = vector.broadcast %cst_27 : f32 to vector<8x1xf32>
      %43 = arith.addf %39, %42 : vector<8x1xf32>
      %cst_28 = arith.constant 9.99999974E-6 : f32
      %44 = vector.broadcast %cst_28 : f32 to vector<8x1xf32>
      %45 = arith.addf %43, %44 : vector<8x1xf32>
      %46 = arith.divf %41, %45 : vector<8x1xf32>
      %c0_29 = arith.constant 0 : index
      %c0_30 = arith.constant 0 : index
      %47 = vector.load %arg4[%c0_29, %c0_30] : memref<8x1xf32, #tpu.memory_space<vmem>>, vector<8x1xf32>
      tpu.vector_store %arg4[%c0_29, %c0_30], %46 {strides = array<i32>} : memref<8x1xf32, #tpu.memory_space<vmem>>, vector<8x1xf32>,
    } else {
    }
    return
  }
  func.func @transform_0(%arg0: i32, %arg1: i32) -> (i32, i32) {
    %c0_i32 = arith.constant 0 : i32
    return %arg0, %arg1 : i32, i32
  }
  func.func @transform_1(%arg0: i32, %arg1: i32) -> (i32, i32) {
    %c0_i32 = arith.constant 0 : i32
    return %arg0, %arg1 : i32, i32
  }
  func.func @transform_2(%arg0: i32, %arg1: i32) -> (i32, i32) {
    %c0_i32 = arith.constant 0 : i32
    %c0_i32_0 = arith.constant 0 : i32
    return %arg0, %c0_i32 : i32, i32
  }
}

</mosaic_0001>

<bundles_post_ra>
// kernel: tpu_custom_call.1
= control target key start
LH: loop header
LB: loop body
LE: loop exit
PB: predicated region body
PF: predicated region fallthrough
CT: control target
= control target key end

     0   :  { %7 = vsyncpa [#allocation5], 0  ;;  %s165_s0 = inlined_call_operand.hbm [shape: f32[8,256], index: 0, kind: input, shape index: {}]   ;;  %s166_s1 = inlined_call_operand.hbm [shape: f32[8,256], index: 1, kind: input, shape index: {}]   ;;  %s167_s2 = inlined_call_operand.vmem [shape: f32[8,1], index: 2, kind: output, shape index: {}]  }
   0x1   :  { %8 = vsyncpa [#allocation7], 0  ;;  %s139_s9 = smov [#allocation4]   ;;  %s140_s11 = smov [#allocation6]  }
   0x2   :  { %s15_s10 = sshll.u32 %s139_s9, 4  ;;  %s25_s12 = sshll.u32 %s140_s11, 4  ;;  %s16_s10 = int_to_ptr.vmem [resolvable:$true] %s15_s10  ;;  %s26_s12 = int_to_ptr.vmem [resolvable:$true] %s25_s12 }
   0x3   :  { %s103_s13 = scalar_lea.vmem %s16_s10, 256  ;;  %p108_p1 = scmp.lt.s32.totalorder %s16_s10, %s16_s10 }
   0x4   :  { %p104_p0 = scmp.ne.s32.totalorder %s16_s10, %s103_s13  ;;  %p109_p2 = scmp.lt.s32.totalorder %s103_s13, %s103_s13 }
   0x6   :  { %p110_p3 = por %p109_p2, %p108_p1 }
   0x8   :  { %p111_p4 = pnand %p110_p3, %p104_p0 }
   0xa   :  { %114 = shalt.err (!%p111_p4)
}
   0xb   :  { %18 = dma.hbm_to_vmem [thread:$0]  %s165_s0, 256, %s16_s10, [#allocation5]  }
   0xc   :  { %s123_s16 = scalar_lea.vmem %s26_s12, 256  ;;  %p128_p6 = scmp.lt.s32.totalorder %s26_s12, %s26_s12 }
   0xd   :  { %p124_p5 = scmp.ne.s32.totalorder %s26_s12, %s123_s16  ;;  %p129_p7 = scmp.lt.s32.totalorder %s123_s16, %s123_s16 }
   0xf   :  { %p130_p8 = por %p129_p7, %p128_p6 }
  0x11   :  { %p131_p9 = pnand %p130_p8, %p124_p5 }
  0x13   :  { %134 = shalt.err (!%p131_p9)
}
  0x14   :  { %28 = dma.hbm_to_vmem [thread:$0]  %s166_s1, 256, %s26_s12, [#allocation7]  }
  0x15   :  { %135 = dma.done.wait [#allocation5], 256  }
  0x16   :  { %136 = vsyncadd [#allocation5], 4294967040 }
  0x17   :  { %137 = dma.done.wait [#allocation7], 256  }
  0x18   :  { %138 = vsyncadd [#allocation7], 4294967040  ;;  %v43_v0 = vld [vmem:[#allocation4] sm:$0xff]  ;;  %v53_v1 = vld [vmem:[#allocation4 + $0x8] sm:$0xff]  ;;  %vm79_vm0 = vcmask 7168  }
  0x19   :  { %v45_v2 = vmul.f32 0.5, %v43_v0  ;;  %v55_v3 = vmul.f32 0.5, %v53_v1  ;;  %v44_v5 = vld [vmem:[#allocation6] sm:$0xff]  ;;  %v54_v8 = vld [vmem:[#allocation6 + $0x8] sm:$0xff] }
  0x1b   :  { %89 = vtanh.f32 %v45_v2 }
  0x1c   :  { %91 = vtanh.f32 %v55_v3 }
  0x28   :  { %v90_v4 = vpop.eup %89 }
  0x29   :  { %v92_v6 = vpop.eup %91  ;;  %v49_v7 = vmul.f32 0.5, %v90_v4  ;;  %v47_v9 = vmul.f32 %v90_v4, %v44_v5 }
  0x2a   :  { %v59_v10 = vmul.f32 0.5, %v92_v6  ;;  %v57_v11 = vmul.f32 %v92_v6, %v54_v8 }
  0x2b   :  { %v50_v12 = vadd.f32 %v49_v7, %v44_v5  ;;  %v48_v14 = vadd.f32 %v47_v9, %v44_v5 }
  0x2c   :  { %v60_v13 = vadd.f32 %v59_v10, %v54_v8  ;;  %v58_v15 = vadd.f32 %v57_v11, %v54_v8 }
  0x2e   :  { %v62_v16 = vadd.f32 %v60_v13, %v50_v12  ;;  %v61_v17 = vadd.f32 %v58_v15, %v48_v14 }
  0x30   :  { %72 = vadd.xlane.f32.xlu0 %v62_v16 }
  0x34   :  { %69 = vadd.xlane.f32.xlu0 %v61_v17 }
  0xb9   :  { %v73_v18 = vpop.xlane.xlu0 %72 }
  0xba   :  { %v75_v19 = vadd.f32 128.0, %v73_v18 }
  0xbc   :  { %v76_v20 = vadd.f32 1e-05, %v75_v19 }
  0xbd   :  { %v70_v21 = vpop.xlane.xlu0 %69 }
  0xbe   :  { %93 = vrcp.f32 %v76_v20  ;;  %v74_v22 = vadd.f32 1e-05, %v70_v21 }
  0xcb   :  { %v94_v23 = vpop.eup %93 }
  0xcc   :  { %v78_v24 = vmul.f32 %v94_v23, %v74_v22 }
  0xce   :  { %80 = vst.msk [vmem:[%s167_s2] sm:$0xff] %vm79_vm0, %v78_v24 }
  0xcf   :  { %85 = vsyncpa [#allocation5], 1 }
  0xd0   :  { %86 = vsyncpa [#allocation7], 1 }

</bundles_post_ra>
